<compile_context>
chip_gen: v7x
topology: tpu7x:2x2x1
jax: 0.10.0
libtpu: 0.0.40
codegen_flags: <defaults>
</compile_context>

<pallas_src>
import jax
import jax.numpy as jnp
from jax.experimental import pallas as pl
from jax.experimental.pallas import tpu as pltpu


def _round_up(x, m):
    return ((x + m - 1) // m) * m


def _default_num_cores():
    """2 TensorCores per device on megacore chips (v4 / v5p / v7x), else 1."""
    try:
        kind = jax.devices()[0].device_kind.lower()
    except Exception:
        return 1
    # Single-TC chips first (v5e / v6e are reported as "... lite" variants).
    if "lite" in kind or "v5e" in kind or "v6e" in kind or "v6" in kind:
        return 1
    for tag in ("v7", "7x", "v5p", "v4"):
        if tag in kind:
            return 2
    return 1


def _make_kernel(batch, d, tb, steps_per_core, split_inputs, needs_mask):
    n_sub = tb // 8

    def body(mu, logvar, y, out_ref, acc_ref):
        c = pl.program_id(0)        # core-partition axis ("parallel")
        s = pl.program_id(1)        # streaming / reduction axis ("arbitrary")

        @pl.when(s == 0)
        def _init():
            acc_ref[...] = jnp.zeros_like(acc_ref)

        # Cast on the VPU (hidden under the HBM-bound DMA); on v5e the f32
        # cast is mandatory anyway.
        mu = mu.astype(jnp.float32)
        logvar = logvar.astype(jnp.float32)
        y = y.astype(jnp.float32)

        diff = mu - y
        terms = diff * diff * jnp.exp(-logvar) + logvar        # (tb, d)

        def accumulate(vals):
            # Fold sublane-tile slabs together with plain vector adds into a
            # single (8, d) accumulator — no full-tile scratch RMW.
            acc_ref[...] += vals.reshape(n_sub, 8, d).sum(axis=0)

        row0 = (c * steps_per_core + s) * tb

        if needs_mask:
            full_tile = row0 + tb <= batch
            in_range = row0 < batch

            @pl.when(full_tile)
            def _fast():
                accumulate(terms)

            @pl.when(jnp.logical_and(in_range, jnp.logical_not(full_tile)))
            def _tail():
                # (tb, 1) mask; jnp.where is a true select so inf/NaN in
                # padded/garbage rows never reaches the accumulator.
                rows = row0 + jax.lax.broadcasted_iota(jnp.int32, (tb, 1), 0)
                accumulate(jnp.where(rows < batch, terms, 0.0))
            # Fully padded steps (row0 >= batch): accumulate nothing; their
            # DMA was already skipped via the clamped index_map.
        else:
            accumulate(terms)

        @pl.when(s == pl.num_programs(1) - 1)
        def _finalize():
            partial = jnp.sum(acc_ref[...])                     # XLU, once/core
            out_ref[...] = jnp.zeros(out_ref.shape, jnp.float32) + partial

    if split_inputs:
        def kernel(mu_ref, logvar_ref, y_ref, out_ref, acc_ref):
            body(mu_ref[...], logvar_ref[...], y_ref[...], out_ref, acc_ref)
    else:
        def kernel(pred_ref, y_ref, out_ref, acc_ref):
            pred = pred_ref[...].astype(jnp.float32)            # (tb, 2*d)
            body(pred[:, :d], pred[:, d:], y_ref[...], out_ref, acc_ref)

    return kernel


def logprob_loss(pred, y, max_logvar, min_logvar, *, tb=None, num_cores=None,
                 reg=0.0):
    """LogProbLoss.forward(pred, y, task_id=tid) — returns -loss - reg."""
    B, two_d = pred.shape
    Bd, d = y.shape
    assert B == Bd and two_d == 2 * d

    if num_cores is None:
        num_cores = _default_num_cores()
    num_cores = max(1, int(num_cores))

    pred_isz = jnp.dtype(pred.dtype).itemsize
    y_isz = jnp.dtype(y.dtype).itemsize
    # Sublane packing multiple of the narrowest streamed dtype.
    sub = {4: 8, 2: 16, 1: 32}.get(min(pred_isz, y_isz), 8)

    # --- tile-size heuristic -------------------------------------------------
    # Streaming, mem-bound kernel: ~4 MiB of inputs per grid step (~8 MiB
    # double-buffered), amortising the ~0.35 us per-step overhead while
    # staying well inside the explicit vmem_limit below on every generation.
    bytes_per_row = 2 * d * pred_isz + d * y_isz
    if tb is None:
        target_step_bytes = 4 * 1024 * 1024
        tb = target_step_bytes // max(1, bytes_per_row)
        tb = max(sub, min(2048, int(tb)))
    tb = max(sub, min(int(tb), _round_up(B, sub)))
    tb = _round_up(tb, sub)

    n_row_blocks = int(pl.cdiv(B, tb))
    num_cores = min(num_cores, n_row_blocks)        # no fully-idle cores
    steps_per_core = int(pl.cdiv(n_row_blocks, num_cores))
    grid = (num_cores, steps_per_core)

    needs_mask = (B % tb != 0) or (num_cores * steps_per_core != n_row_blocks)
    split_inputs = (d % 128 == 0)                   # lane-aligned DMA split

    max_block = n_row_blocks - 1

    def row_index(c, s):
        # Clamp so padded / idle steps repeat the last valid block and the
        # pipeline skips their DMA (block index unchanged -> no HBM traffic).
        return jnp.minimum(c * steps_per_core + s, max_block)

    if split_inputs:
        in_specs = [
            pl.BlockSpec((tb, d), lambda c, s: (row_index(c, s), 0)),   # mu
            pl.BlockSpec((tb, d), lambda c, s: (row_index(c, s), 1)),   # logvar
            pl.BlockSpec((tb, d), lambda c, s: (row_index(c, s), 0)),   # y
        ]
        operands = (pred, pred, y)
    else:
        in_specs = [
            pl.BlockSpec((tb, two_d), lambda c, s: (row_index(c, s), 0)),
            pl.BlockSpec((tb, d), lambda c, s: (row_index(c, s), 0)),
        ]
        operands = (pred, y)

    block_in_bytes = tb * bytes_per_row
    # Above v5e's 16 MiB scoped default, below v7x's 64 MiB physical VMEM.
    vmem_limit_bytes = int(min(max(2 * block_in_bytes + (4 << 20), 32 << 20),
                               40 << 20))

    kernel = _make_kernel(B, d, tb, steps_per_core, split_inputs, needs_mask)

    partials = pl.pallas_call(
        kernel,
        # One (8, 128) f32 slab per core keeps the output lane-dense and
        # tile-aligned; each core broadcasts its scalar partial into it.
        out_shape=jax.ShapeDtypeStruct((num_cores, 8, 128), jnp.float32),
        grid_spec=pltpu.PrefetchScalarGridSpec(
            num_scalar_prefetch=0,
            grid=grid,
            in_specs=in_specs,
            out_specs=pl.BlockSpec((1, 8, 128), lambda c, s: (c, 0, 0)),
            scratch_shapes=[pltpu.VMEM((8, d), jnp.float32)],
        ),
        compiler_params=pltpu.CompilerParams(
            dimension_semantics=("parallel", "arbitrary"),
            vmem_limit_bytes=vmem_limit_bytes,
        ),
    )(*operands)

    total = jnp.sum(partials[:, 0, 0])
    # Glue: 1/d scale, O(D) logvar-bound term, negation, (zero) regularizer.
    loss = total / jnp.float32(d) + 0.01 * (jnp.sum(max_logvar)
                                            - jnp.sum(min_logvar))
    # TODO(synk): coreset replay path (self.model.replay(i), M>0) and the L1
    # parameter regularizer depend on external model state; reg_lambda=0 here.
    return -loss - reg


def _reference(pred, y, max_logvar, min_logvar):
    d = y.shape[-1]
    pred = pred.astype(jnp.float32)
    y = y.astype(jnp.float32)
    mu, logvar = pred[:, :d], pred[:, d:]
    loss = jnp.sum((mu - y) ** 2 * jnp.exp(-logvar) + logvar) / d
    loss = loss + 0.01 * (jnp.sum(max_logvar) - jnp.sum(min_logvar))
    return -loss


if __name__ == "__main__":
    key = jax.random.PRNGKey(0)

    def run_case(B, D, dtype, **kw):
        k1, k2 = jax.random.split(jax.random.fold_in(key, B * 1000 + D))
        pred = jax.random.normal(k1, (B, 2 * D), dtype=jnp.float32).astype(dtype)
        y = jax.random.normal(k2, (B, D), dtype=jnp.float32).astype(dtype)
        # hypercrl GaussianMLP convention for the per-task logvar bounds.
        max_logvar = jnp.full((1, D), 0.5, dtype=jnp.float32)
        min_logvar = jnp.full((1, D), -10.0, dtype=jnp.float32)
        out = jax.block_until_ready(
            logprob_loss(pred, y, max_logvar, min_logvar, **kw))
        ref = _reference(pred, y, max_logvar, min_logvar)
        if not jnp.allclose(out, ref, rtol=1e-4, atol=1e-3):
            raise AssertionError(
                f"mismatch B={B} D={D} dtype={dtype}: kernel={out} ref={ref}")

    # Small shape implied by the module: batch=16, y_dim=32 -> pred=(16, 64).
    # Exercises the in-kernel mu/logvar split path (d % 128 != 0), one tile.
    run_case(16, 32, jnp.float32)
    # DMA-level split (d % 128 == 0), remainder tile, clamped padded steps,
    # and two per-core partial accumulators.
    run_case(300, 128, jnp.float32, tb=64, num_cores=2)
    # bf16 streaming path (sublane-packing-aware tb rounding, in-kernel cast).
    run_case(64, 32, jnp.bfloat16)

    print("KERNEL_OK")
</pallas_src>

<mosaic_0001>
module attributes {stable_mosaic.version = 11 : i64} {
  func.func @kernel(%arg0: i32, %arg1: i32, %arg2: memref<16x64xf32, #tpu.memory_space<vmem>>, %arg3: memref<16x32xf32, #tpu.memory_space<vmem>>, %arg4: memref<1x8x128xf32, #tpu.memory_space<vmem>>, %arg5: memref<8x32xf32, #tpu.memory_space<vmem>>) attributes {dimension_semantics = [#tpu.dimension_semantics<parallel>, #tpu.dimension_semantics<arbitrary>], iteration_bounds = array<i64: 1, 1>, scalar_prefetch = 0 : i64, scratch_operands = 1 : i64, tpu.core_type = #tpu.core_type<tc>, window_params = [{transform_indices = @transform_0, window_bounds = array<i64: 16, 64>}, {transform_indices = @transform_1, window_bounds = array<i64: 16, 32>}, {transform_indices = @transform_2, window_bounds = array<i64: 1, 8, 128>}]} {
    %c0 = arith.constant 0 : index
    %c0_0 = arith.constant 0 : index
    %0 = vector.load %arg2[%c0, %c0_0] : memref<16x64xf32, #tpu.memory_space<vmem>>, vector<16x64xf32>
    %1 = vector.extract_strided_slice %0 {offsets = [0, 0], sizes = [16, 32], strides = [1, 1]} : vector<16x64xf32> to vector<16x32xf32>
    %2 = vector.extract_strided_slice %0 {offsets = [0, 32], sizes = [16, 32], strides = [1, 1]} : vector<16x64xf32> to vector<16x32xf32>
    %c0_1 = arith.constant 0 : index
    %c0_2 = arith.constant 0 : index
    %3 = vector.load %arg3[%c0_1, %c0_2] : memref<16x32xf32, #tpu.memory_space<vmem>>, vector<16x32xf32>
    %c0_i32 = arith.constant 0 : i32
    %4 = arith.cmpi eq, %arg1, %c0_i32 : i32
    %5 = arith.extui %4 : i1 to i32
    %c0_i32_3 = arith.constant 0 : i32
    %6 = arith.cmpi ne, %5, %c0_i32_3 : i32
    scf.if %6 {
      %cst_11 = arith.constant 0.000000e+00 : f32
      %22 = vector.broadcast %cst_11 : f32 to vector<8x32xf32>
      %c0_12 = arith.constant 0 : index
      %c0_13 = arith.constant 0 : index
      %23 = vector.load %arg5[%c0_12, %c0_13] : memref<8x32xf32, #tpu.memory_space<vmem>>, vector<8x32xf32>
      tpu.vector_store %arg5[%c0_12, %c0_13], %22 {strides = array<i32>} : memref<8x32xf32, #tpu.memory_space<vmem>>, vector<8x32xf32>,
    } else {
    }
    %7 = arith.subf %1, %3 : vector<16x32xf32>
    %8 = arith.mulf %7, %7 : vector<16x32xf32>
    %cst = arith.constant 0.000000e+00 : f32
    %9 = vector.broadcast %cst : f32 to vector<16x32xf32>
    %10 = arith.subf %9, %2 : vector<16x32xf32>
    %11 = math.exp %10 : vector<16x32xf32>
    %12 = arith.mulf %8, %11 : vector<16x32xf32>
    %13 = arith.addf %12, %2 : vector<16x32xf32>
    %c0_4 = arith.constant 0 : index
    %c0_5 = arith.constant 0 : index
    %14 = vector.load %arg5[%c0_4, %c0_5] : memref<8x32xf32, #tpu.memory_space<vmem>>, vector<8x32xf32>
    %15 = vector.shape_cast %13 : vector<16x32xf32> to vector<2x8x32xf32>
    %cst_6 = arith.constant dense<0.000000e+00> : vector<8x32xf32>
    %16 = vector.multi_reduction <add>, %15, %cst_6 [0] : vector<2x8x32xf32> to vector<8x32xf32>
    %17 = arith.addf %14, %16 : vector<8x32xf32>
    %c0_7 = arith.constant 0 : index
    %c0_8 = arith.constant 0 : index
    %18 = vector.load %arg5[%c0_7, %c0_8] : memref<8x32xf32, #tpu.memory_space<vmem>>, vector<8x32xf32>
    tpu.vector_store %arg5[%c0_7, %c0_8], %17 {strides = array<i32>} : memref<8x32xf32, #tpu.memory_space<vmem>>, vector<8x32xf32>,
    %c0_i32_9 = arith.constant 0 : i32
    %19 = arith.cmpi eq, %arg1, %c0_i32_9 : i32
    %20 = arith.extui %19 : i1 to i32
    %c0_i32_10 = arith.constant 0 : i32
    %21 = arith.cmpi ne, %20, %c0_i32_10 : i32
    scf.if %21 {
      %c0_11 = arith.constant 0 : index
      %c0_12 = arith.constant 0 : index
      %22 = vector.load %arg5[%c0_11, %c0_12] : memref<8x32xf32, #tpu.memory_space<vmem>>, vector<8x32xf32>
      %23 = vector.shape_cast %22 : vector<8x32xf32> to vector<1x8x32xf32>
      %cst_13 = arith.constant dense<0.000000e+00> : vector<1xf32>
      %24 = vector.multi_reduction <add>, %23, %cst_13 [1, 2] : vector<1x8x32xf32> to vector<1xf32>
      %25 = vector.shape_cast %24 : vector<1xf32> to vector<1x1x1xf32>
      %26 = vector.extract %25[0, 0, 0] : f32 from vector<1x1x1xf32>
      %cst_14 = arith.constant 0.000000e+00 : f32
      %27 = vector.broadcast %cst_14 : f32 to vector<1x8x128xf32>
      %28 = vector.broadcast %26 : f32 to vector<1x8x128xf32>
      %29 = arith.addf %27, %28 : vector<1x8x128xf32>
      %c0_15 = arith.constant 0 : index
      %c0_16 = arith.constant 0 : index
      %c0_17 = arith.constant 0 : index
      %30 = vector.load %arg4[%c0_15, %c0_16, %c0_17] : memref<1x8x128xf32, #tpu.memory_space<vmem>>, vector<1x8x128xf32>
      tpu.vector_store %arg4[%c0_15, %c0_16, %c0_17], %29 {strides = array<i32>} : memref<1x8x128xf32, #tpu.memory_space<vmem>>, vector<1x8x128xf32>,
    } else {
    }
    return
  }
  func.func @transform_0(%arg0: i32, %arg1: i32) -> (i32, i32) {
    %c1_i32 = arith.constant 1 : i32
    %0 = arith.muli %arg0, %c1_i32 : i32
    %1 = arith.addi %0, %arg1 : i32
    %c0_i32 = arith.constant 0 : i32
    %2 = arith.minsi %1, %c0_i32 : i32
    %c0_i32_0 = arith.constant 0 : i32
    %c0_i32_1 = arith.constant 0 : i32
    return %2, %c0_i32_0 : i32, i32
  }
  func.func @transform_1(%arg0: i32, %arg1: i32) -> (i32, i32) {
    %c1_i32 = arith.constant 1 : i32
    %0 = arith.muli %arg0, %c1_i32 : i32
    %1 = arith.addi %0, %arg1 : i32
    %c0_i32 = arith.constant 0 : i32
    %2 = arith.minsi %1, %c0_i32 : i32
    %c0_i32_0 = arith.constant 0 : i32
    %c0_i32_1 = arith.constant 0 : i32
    return %2, %c0_i32_0 : i32, i32
  }
  func.func @transform_2(%arg0: i32, %arg1: i32) -> (i32, i32, i32) {
    %c0_i32 = arith.constant 0 : i32
    %c0_i32_0 = arith.constant 0 : i32
    %c0_i32_1 = arith.constant 0 : i32
    return %arg0, %c0_i32, %c0_i32_0 : i32, i32, i32
  }
}

</mosaic_0001>

<bundles_post_ra>
// kernel: tpu_custom_call.1
= control target key start
LH: loop header
LB: loop body
LE: loop exit
PB: predicated region body
PF: predicated region fallthrough
CT: control target
= control target key end

     0   :  { %7 = vsyncpa [#allocation4], 0  ;;  %s292_s0 = inlined_call_operand.hbm [shape: f32[16,64], index: 0, kind: input, shape index: {}]   ;;  %s293_s1 = inlined_call_operand.hbm [shape: f32[16,32], index: 1, kind: input, shape index: {}]   ;;  %s294_s2 = inlined_call_operand.hbm [shape: f32[1,8,128], index: 2, kind: output, shape index: {}]  }
   0x1   :  { %8 = vsyncpa [#allocation7], 0 }
   0x2   :  { %9 = vsyncpa [#allocation5], 0  ;;  %s229_s9 = smov [#allocation3]   ;;  %s157_s13 = scalar_lea.hbm %s292_s0, 256 }
   0x3   :  { %s21_s10 = sshll.u32 %s229_s9, 4  ;;  %p158_p0 = scmp.ne.s32.totalorder %s292_s0, %s157_s13  ;;  %s22_s10 = int_to_ptr.vmem [resolvable:$true] %s21_s10 }
   0x4   :  { %p161_p1 = scmp.lt.u32.totalorder %s157_s13, %s292_s0 }
   0x6   :  { %p163_p2 = pnand %p161_p1, %p158_p0 }
   0x8   :  { %166 = shalt.err (!%p163_p2)
}
   0x9   :  { %s167_s18 = scalar_lea.vmem %s22_s10, 256  ;;  %p172_p4 = scmp.lt.s32.totalorder %s22_s10, %s22_s10 }
   0xa   :  { %p168_p3 = scmp.ne.s32.totalorder %s22_s10, %s167_s18  ;;  %p173_p5 = scmp.lt.s32.totalorder %s167_s18, %s167_s18 }
   0xc   :  { %p174_p6 = por %p173_p5, %p172_p4 }
   0xe   :  { %p175_p7 = pnand %p174_p6, %p168_p3 }
  0x10   :  { %178 = shalt.err (!%p175_p7)
}
  0x11   :  { %s230_s19 = smov 128   ;;  %s231_s20 = smov 8  }
  0x12   :  { %27 = dma.hbm_to_vmem [thread:$0]  %s292_s0, 256, %s22_s10, [#allocation4], %s230_s19, %s230_s19, %s231_s20  }
  0x13   :  { %s232_s23 = smov [#allocation6]   ;;  %s179_s27 = scalar_lea.hbm %s293_s1, 256 }
  0x14   :  { %s39_s24 = sshll.u32 %s232_s23, 4  ;;  %p180_p8 = scmp.ne.s32.totalorder %s293_s1, %s179_s27  ;;  %s40_s24 = int_to_ptr.vmem [resolvable:$true] %s39_s24 }
  0x15   :  { %p183_p9 = scmp.lt.u32.totalorder %s179_s27, %s293_s1 }
  0x17   :  { %p185_p10 = pnand %p183_p9, %p180_p8 }
  0x19   :  { %188 = shalt.err (!%p185_p10)
}
  0x1a   :  { %s189_s4 = scalar_lea.vmem %s40_s24, 256  ;;  %p194_p12 = scmp.lt.s32.totalorder %s40_s24, %s40_s24 }
  0x1b   :  { %p190_p11 = scmp.ne.s32.totalorder %s40_s24, %s189_s4  ;;  %p195_p13 = scmp.lt.s32.totalorder %s189_s4, %s189_s4 }
  0x1d   :  { %p196_p0 = por %p195_p13, %p194_p12 }
  0x1f   :  { %p197_p1 = pnand %p196_p0, %p190_p11 }
  0x21   :  { %200 = shalt.err (!%p197_p1)
}
  0x22   :  { %45 = dma.hbm_to_vmem [thread:$0]  %s293_s1, 256, %s40_s24, [#allocation7], %s230_s19, %s230_s19, %s231_s20  }
  0x23   :  { %223 = dma.done.wait [#allocation4], 256  }
  0x24   :  { %224 = vsyncadd [#allocation4], 4294967040 }
  0x25   :  { %225 = dma.done.wait [#allocation7], 256  }
  0x26   :  { %226 = vsyncadd [#allocation7], 4294967040  ;;  %v60_v0 = vld [vmem:[#allocation3] sm:$0xff]  ;;  %v61_v1 = vld [vmem:[#allocation3 + $0x8] sm:$0xff]  ;;  %s233_s6 = smov 96   ;;  %vm68_vm0 = vcmask 261120  }
  0x27   :  { %v74_v2 = vsub.f32 0.0, %v60_v0  ;;  %92 = vrot.lane.b32.xlu1 %v60_v0, %s233_s6  ;;  %v75_v3 = vsub.f32 0.0, %v61_v1  ;;  %v234_v6 = vmov 0.0   ;;  %v62_v9 = vld [vmem:[#allocation6] sm:$0xff]  ;;  %v63_v11 = vld [vmem:[#allocation6 + $0x8] sm:$0xff]  ;;  %s235_s1 = smov [#allocation8]  }
  0x28   :  { %69 = vst.msk [vmem:[#allocation2] sm:$0xff] %vm68_vm0, %v234_v6  ;;  %v70_v10 = vsub.f32 %v60_v0, %v62_v9  ;;  %v71_v13 = vsub.f32 %v61_v1, %v63_v11  ;;  %s130_s7 = sshll.u32 %s235_s1, 4  ;;  %s131_s7 = int_to_ptr.vmem [resolvable:$true] %s130_s7 }
  0x29   :  { %v76_v4 = vmul.f32 1.442695, %v74_v2  ;;  %v78_v5 = vmul.f32 1.442695, %v75_v3  ;;  %s201_s9 = scalar_lea.vmem %s131_s7, 128  ;;  %p206_p3 = scmp.lt.s32.totalorder %s131_s7, %s131_s7 }
  0x2a   :  { %v72_v12 = vmul.f32 %v70_v10, %v70_v10  ;;  %v73_v17 = vmul.f32 %v71_v13, %v71_v13  ;;  %p202_p2 = scmp.ne.s32.totalorder %s131_s7, %s201_s9  ;;  %p207_p4 = scmp.lt.s32.totalorder %s201_s9, %s201_s9 }
  0x2b   :  { %153 = vpow2.f32 %v76_v4  ;;  %94 = vrot.lane.b32.xlu1 %v61_v1, %s233_s6 }
  0x2c   :  { %155 = vpow2.f32 %v78_v5  ;;  %p208_p5 = por %p207_p4, %p206_p3 }
  0x2e   :  { %p209_p6 = pnand %p208_p5, %p202_p2 }
  0x2f   :  { %v100_v24 = vld [vmem:[#allocation2] sm:$0xff] }
  0x35   :  { %v154_v7 = vpop.eup %153 }
  0x36   :  { %82 = vrot.lane.b32.xlu0 %v154_v7, %s233_s6  ;;  %v156_v8 = vpop.eup %155 }
  0x3a   :  { %84 = vrot.lane.b32.xlu0 %v156_v8, %s233_s6 }
  0x99   :  { %v93_v14 = vpop.permute.xlu1 %92 }
  0x9d   :  { %v95_v19 = vpop.permute.xlu1 %94 }
  0xa8   :  { %v83_v15 = vpop.permute.xlu0 %82 }
  0xa9   :  { %v88_v16 = vmul.f32 %v83_v15, %v72_v12 }
  0xab   :  { %v98_v20 = vadd.f32 %v93_v14, %v88_v16 }
  0xac   :  { %v85_v18 = vpop.permute.xlu0 %84 }
  0xad   :  { %v89_v21 = vmul.f32 %v85_v18, %v73_v17  ;;  %v102_v23 = vsel %vm68_vm0, %v98_v20, 0.0 }
  0xaf   :  { %v99_v22 = vadd.f32 %v95_v19, %v89_v21 }
  0xb1   :  { %v103_v25 = vsel %vm68_vm0, %v99_v22, 0.0 }
  0xb2   :  { %v104_v26 = vadd.f32 %v103_v25, %v102_v23 }
  0xb4   :  { %v105_v27 = vadd.f32 %v104_v26, %v100_v24 }
  0xb6   :  { %106 = vst.msk [vmem:[#allocation2] sm:$0xff] %vm68_vm0, %v105_v27 }
  0xbd   :  { %v110_v28 = vld [vmem:[#allocation2] sm:$0xff] }
  0xbe   :  { %v111_v29 = vsel %vm68_vm0, %v110_v28, 0.0 }
  0xbf   :  { %112 = vadd.xlane.f32.xlu0 %v111_v29 }
 0x14c   :  { %v113_v30 = vpop.xlane.xlu0 %112 }
 0x14d   :  { %v114_v31 = vrot.slane %v113_v30, 4 }
 0x14f   :  { %v115_v32 = vadd.f32 %v114_v31, %v113_v30 }
 0x151   :  { %v116_v33 = vrot.slane %v115_v32, 2 }
 0x153   :  { %v117_v34 = vadd.f32 %v116_v33, %v115_v32 }
 0x155   :  { %v118_v35 = vrot.slane %v117_v34, 1 }
 0x157   :  { %v119_v36 = vadd.f32 %v118_v35, %v117_v34 }
 0x159   :  { %144 = vpush %v119_v36 }
 0x18a   :  { %s145_s8 = spop %144 }
 0x18b   :  { %v121_v37 = vstv %s145_s8 }
 0x18c   :  { %123 = vst [vmem:[#allocation8] sm:$0xff] %v121_v37 }
 0x18d   :  { %212 = shalt.err (!%p209_p6)
}
 0x18e   :  { %s213_s12 = scalar_lea.hbm %s294_s2, 128 }
 0x18f   :  { %p214_p7 = scmp.ne.s32.totalorder %s294_s2, %s213_s12  ;;  %p217_p8 = scmp.lt.u32.totalorder %s213_s12, %s294_s2 }
 0x191   :  { %p219_p9 = pnand %p217_p8, %p214_p7 }
 0x193   :  { %222 = shalt.err (!%p219_p9)
}
 0x194   :  { %133 = dma.vmem_to_hbm [thread:$0]  %s131_s7, 128, %s294_s2, [#allocation5]  }
 0x195   :  { %227 = dma.done.wait [#allocation5], 128  }
 0x196   :  { %228 = vsyncadd [#allocation5], 4294967168 }
 0x197   :  { %137 = vsyncpa [#allocation4], 1 }
 0x198   :  { %138 = vsyncpa [#allocation7], 1 }
 0x199   :  { %139 = vsyncpa [#allocation5], 1 }

</bundles_post_ra>
